<compile_context>
chip_gen: v7x
topology: tpu7x:2x2x1
jax: 0.10.0
libtpu: 0.0.40
codegen_flags: <defaults>
</compile_context>

<pallas_src>
import functools

import jax
import jax.numpy as jnp
from jax.experimental import pallas as pl
from jax.experimental.pallas import tpu as pltpu


def _mlp_kernel(x_ref, *refs, n_layers):
    """refs = (w_0, shift_0, ..., w_{L-1}, shift_{L-1}, o_ref).

    w_l   : (d_l, d_{l+1}) bf16, BN scale already folded into the columns.
    shift : (1, d_{l+1})   f32,  Linear bias + BN shift folded.
    """
    o_ref = refs[-1]
    p = refs[:-1]
    h = x_ref[...]                                         # bf16 (tile, d_in)
    acc = None
    for l in range(n_layers):
        w = p[2 * l][...]                                  # bf16 (d_l, d_{l+1})
        shift = p[2 * l + 1][...]                          # f32  (1, d_{l+1})
        # MXU: bf16 x bf16 -> f32 accumulate (single-pass path).
        acc = jnp.dot(h, w, preferred_element_type=jnp.float32) + shift
        if l < n_layers - 1:
            acc = jnp.maximum(acc, 0.0)                    # ReLU; Dropout(eval)=identity
            h = acc.astype(w.dtype)                        # bf16 only for next MXU operands
    o_ref[...] = acc.astype(o_ref.dtype)


def _round_up(n, m):
    return ((n + m - 1) // m) * m


def fold_layer(w, b, gamma=None, beta=None, running_mean=None, running_var=None, eps=1e-5):
    """Fold Linear bias + eval-mode BatchNorm1d into (W', shift).

    gamma * ((x@W + b) - rm) / sqrt(rv + eps) + beta == x @ (W * s) + ((b - rm) * s + beta)
    with s = gamma / sqrt(rv + eps).  For the final (BN-less) Linear: (W, b).
    """
    if gamma is None:
        return w, b
    s = gamma / jnp.sqrt(running_var + eps)
    return w * s[None, :], (b - running_mean) * s + beta


def mlp_forward(x, layers, *, tile_rows=1024, compute_dtype=jnp.bfloat16):
    """x: (rows, d_in) f32.  layers: list of (W' (d_l, d_{l+1}), shift (d_{l+1},))
    with the BN scale already folded into W' (see fold_layer)."""
    rows, d_in = x.shape
    n_layers = len(layers)
    dims = [d_in] + [w.shape[1] for w, _ in layers]
    d_out = dims[-1]
    out_dtype = x.dtype

    # ---- explicit VMEM budget, per generation --------------------------------
    vmem_cap = 64 * 1024 * 1024                 # conservative (v7x per-TC) fallback
    try:
        vmem_cap = int(pltpu.get_tpu_info().vmem_capacity_bytes)
    except Exception:
        pass
    vmem_limit = int(min(vmem_cap // 2, 32 * 1024 * 1024))   # scoped limit we request
    budget = (vmem_limit * 3) // 4                            # tiling budget (headroom)

    cd_bytes = jnp.dtype(compute_dtype).itemsize
    out_bytes = jnp.dtype(out_dtype).itemsize
    # Resident weights + shifts (double-buffered by the default pipeliner).
    weight_bytes = 2 * sum(int(w.size) * cd_bytes + int(s.size) * 4 for w, s in layers)
    # Per-row cost: 2x double-buffered streamed input, 2x output, f32 intermediates.
    max_hidden = max(dims[1:])
    per_row = (2 * d_in * cd_bytes
               + 2 * d_out * out_bytes
               + 4 * (d_in + 2 * max_hidden))
    row_mult = 16 if cd_bytes < 4 else 8        # sublane packing of the streamed dtype
    tile_by_vmem = max(row_mult,
                       ((budget - weight_bytes) // per_row) // row_mult * row_mult)

    # Keep >= 2 grid steps when rows allow: both v7x TensorCores get work and the
    # input DMA can pipeline against compute.  Never exceed the rows themselves.
    min_steps = 2
    tile = min(tile_rows,
               tile_by_vmem,
               _round_up(pl.cdiv(rows, min_steps), row_mult),
               _round_up(rows, row_mult))
    tile = max(row_mult, (tile // row_mult) * row_mult)

    grid = (pl.cdiv(rows, tile),)               # partial last block handled by Pallas

    x_lp = x.astype(compute_dtype)
    in_specs = [pl.BlockSpec((tile, d_in), lambda i: (i, 0))]
    flat_params = []
    for w, shift in layers:
        w_lp = w.astype(compute_dtype)
        s2 = shift.astype(jnp.float32).reshape(1, -1)
        for arr in (w_lp, s2):
            # Full-array block, constant index_map -> stays resident in VMEM.
            in_specs.append(pl.BlockSpec(arr.shape, lambda i: (0, 0)))
            flat_params.append(arr)

    out_specs = pl.BlockSpec((tile, d_out), lambda i: (i, 0))

    return pl.pallas_call(
        functools.partial(_mlp_kernel, n_layers=n_layers),
        out_shape=jax.ShapeDtypeStruct((rows, d_out), out_dtype),
        grid_spec=pltpu.PrefetchScalarGridSpec(
            num_scalar_prefetch=0,
            grid=grid,
            in_specs=in_specs,
            out_specs=out_specs,
        ),
        compiler_params=pltpu.CompilerParams(
            dimension_semantics=("parallel",),   # rows independent -> megacore-shardable
            vmem_limit_bytes=vmem_limit,
        ),
    )(x_lp, *flat_params)


if __name__ == "__main__":
    # Smallest "nice" in_featuresize keeping every hidden width >= 2.
    in_featuresize = 384
    out_featuresize = 16
    batch = 16
    eps = 1e-5

    d0 = in_featuresize
    dims = [d0, d0 * 2 // 3]          # 256
    dims.append(dims[-1] // 2)        # 128
    dims.append(dims[-1] // 2)        # 64
    dims.append(dims[-1] // 4)        # 16
    dims.append(dims[-1] // 8)        # 2
    dims.append(out_featuresize)      # 16

    key = jax.random.PRNGKey(0)
    keys = jax.random.split(key, 64)
    ki = iter(range(64))

    x = jax.random.normal(keys[next(ki)], (batch, d0), dtype=jnp.float32)

    raw = []      # unfolded parameters for the pure-JAX reference
    layers = []   # (folded W', shift) fed to the kernel
    for l in range(6):
        din, dout = dims[l], dims[l + 1]
        w = jax.random.normal(keys[next(ki)], (din, dout), dtype=jnp.float32) / jnp.sqrt(din)
        b = 0.1 * jax.random.normal(keys[next(ki)], (dout,), dtype=jnp.float32)
        if l < 5:
            gamma = 1.0 + 0.1 * jax.random.normal(keys[next(ki)], (dout,), dtype=jnp.float32)
            beta = 0.1 * jax.random.normal(keys[next(ki)], (dout,), dtype=jnp.float32)
            rm = 0.1 * jax.random.normal(keys[next(ki)], (dout,), dtype=jnp.float32)
            rv = 1.0 + 0.5 * jax.random.uniform(keys[next(ki)], (dout,), dtype=jnp.float32)
            raw.append((w, b, gamma, beta, rm, rv))
            layers.append(fold_layer(w, b, gamma, beta, rm, rv, eps))
        else:
            raw.append((w, b, None, None, None, None))
            layers.append(fold_layer(w, b))

    out = mlp_forward(x, layers)
    jax.block_until_ready(out)
    assert out.shape == (batch, out_featuresize)

    # Reference 1: mimic the kernel's numerics (bf16 operands, f32 accumulation)
    # on the folded parameters -- tight check of the fused implementation.
    hb = x
    for l, (w, shift) in enumerate(layers):
        a = jnp.dot(hb.astype(jnp.bfloat16).astype(jnp.float32),
                    w.astype(jnp.bfloat16).astype(jnp.float32),
                    precision=jax.lax.Precision.HIGHEST) + shift
        if l < 5:
            a = jnp.maximum(a, 0.0)
        hb = a
    ref_bf16 = hb
    diff_bf16 = float(jnp.max(jnp.abs(out - ref_bf16)))
    assert jnp.allclose(out, ref_bf16, atol=2e-3, rtol=2e-3), \
        f"kernel vs bf16-operand reference mismatch: {diff_bf16}"

    # Reference 2: exact eval-mode PyTorch semantics in f32 (BN running stats,
    # Dropout = identity).  Looser tolerance because the kernel uses bf16 MXU
    # operands (f32 accumulation).
    h = x
    for l in range(6):
        w, b, gamma, beta, rm, rv = raw[l]
        h = jnp.dot(h, w, precision=jax.lax.Precision.HIGHEST) + b
        if l < 5:
            h = gamma * (h - rm) / jnp.sqrt(rv + eps) + beta
            h = jnp.maximum(h, 0.0)
    ref_f32 = h
    diff_f32 = float(jnp.max(jnp.abs(out - ref_f32)))
    assert jnp.allclose(out, ref_f32, atol=3e-2, rtol=3e-2), \
        f"kernel vs f32 eval-mode reference mismatch: {diff_f32}"

    print("KERNEL_OK")
</pallas_src>

<mosaic_0001>
module attributes {stable_mosaic.version = 11 : i64} {
  func.func @_mlp_kernel(%arg0: i32, %arg1: memref<16x384xbf16, #tpu.memory_space<vmem>>, %arg2: memref<384x256xbf16, #tpu.memory_space<vmem>>, %arg3: memref<1x256xf32, #tpu.memory_space<vmem>>, %arg4: memref<256x128xbf16, #tpu.memory_space<vmem>>, %arg5: memref<1x128xf32, #tpu.memory_space<vmem>>, %arg6: memref<128x64xbf16, #tpu.memory_space<vmem>>, %arg7: memref<1x64xf32, #tpu.memory_space<vmem>>, %arg8: memref<64x16xbf16, #tpu.memory_space<vmem>>, %arg9: memref<1x16xf32, #tpu.memory_space<vmem>>, %arg10: memref<16x2xbf16, #tpu.memory_space<vmem>>, %arg11: memref<1x2xf32, #tpu.memory_space<vmem>>, %arg12: memref<2x16xbf16, #tpu.memory_space<vmem>>, %arg13: memref<1x16xf32, #tpu.memory_space<vmem>>, %arg14: memref<16x16xf32, #tpu.memory_space<vmem>>) attributes {dimension_semantics = [#tpu.dimension_semantics<parallel>], iteration_bounds = array<i64: 1>, scalar_prefetch = 0 : i64, scratch_operands = 0 : i64, tpu.core_type = #tpu.core_type<tc>, window_params = [{transform_indices = @transform_0, window_bounds = array<i64: 16, 384>}, {pipeline_mode = #tpu.pipeline_mode<synchronous>, transform_indices = @transform_1, window_bounds = array<i64: 384, 256>}, {pipeline_mode = #tpu.pipeline_mode<synchronous>, transform_indices = @transform_2, window_bounds = array<i64: 1, 256>}, {pipeline_mode = #tpu.pipeline_mode<synchronous>, transform_indices = @transform_3, window_bounds = array<i64: 256, 128>}, {pipeline_mode = #tpu.pipeline_mode<synchronous>, transform_indices = @transform_4, window_bounds = array<i64: 1, 128>}, {pipeline_mode = #tpu.pipeline_mode<synchronous>, transform_indices = @transform_5, window_bounds = array<i64: 128, 64>}, {pipeline_mode = #tpu.pipeline_mode<synchronous>, transform_indices = @transform_6, window_bounds = array<i64: 1, 64>}, {pipeline_mode = #tpu.pipeline_mode<synchronous>, transform_indices = @transform_7, window_bounds = array<i64: 64, 16>}, {pipeline_mode = #tpu.pipeline_mode<synchronous>, transform_indices = @transform_8, window_bounds = array<i64: 1, 16>}, {pipeline_mode = #tpu.pipeline_mode<synchronous>, transform_indices = @transform_9, window_bounds = array<i64: 16, 2>}, {pipeline_mode = #tpu.pipeline_mode<synchronous>, transform_indices = @transform_10, window_bounds = array<i64: 1, 2>}, {pipeline_mode = #tpu.pipeline_mode<synchronous>, transform_indices = @transform_11, window_bounds = array<i64: 2, 16>}, {pipeline_mode = #tpu.pipeline_mode<synchronous>, transform_indices = @transform_12, window_bounds = array<i64: 1, 16>}, {transform_indices = @transform_13, window_bounds = array<i64: 16, 16>}]} {
    %c0 = arith.constant 0 : index
    %c0_0 = arith.constant 0 : index
    %0 = vector.load %arg1[%c0, %c0_0] : memref<16x384xbf16, #tpu.memory_space<vmem>>, vector<16x384xbf16>
    %c0_1 = arith.constant 0 : index
    %c0_2 = arith.constant 0 : index
    %1 = vector.load %arg2[%c0_1, %c0_2] : memref<384x256xbf16, #tpu.memory_space<vmem>>, vector<384x256xbf16>
    %c0_3 = arith.constant 0 : index
    %c0_4 = arith.constant 0 : index
    %2 = vector.load %arg3[%c0_3, %c0_4] : memref<1x256xf32, #tpu.memory_space<vmem>>, vector<1x256xf32>
    %cst = arith.constant dense<0.000000e+00> : vector<16x256xf32>
    %3 = tpu.matmul %0, %1, %cst {dimension_numbers = #tpu.dot_dimension_numbers<[1], [0], [0], [1], [0, 0, 1, 1], [], []>} : vector<16x384xbf16>, vector<384x256xbf16>, vector<16x256xf32> -> vector<16x256xf32>
    %4 = vector.broadcast %2 : vector<1x256xf32> to vector<16x256xf32>
    %5 = arith.addf %3, %4 : vector<16x256xf32>
    %cst_5 = arith.constant 0.000000e+00 : f32
    %6 = vector.broadcast %cst_5 : f32 to vector<16x256xf32>
    %7 = arith.maximumf %5, %6 : vector<16x256xf32>
    %8 = arith.truncf %7 : vector<16x256xf32> to vector<16x256xbf16>
    %c0_6 = arith.constant 0 : index
    %c0_7 = arith.constant 0 : index
    %9 = vector.load %arg4[%c0_6, %c0_7] : memref<256x128xbf16, #tpu.memory_space<vmem>>, vector<256x128xbf16>
    %c0_8 = arith.constant 0 : index
    %c0_9 = arith.constant 0 : index
    %10 = vector.load %arg5[%c0_8, %c0_9] : memref<1x128xf32, #tpu.memory_space<vmem>>, vector<1x128xf32>
    %cst_10 = arith.constant dense<0.000000e+00> : vector<16x128xf32>
    %11 = tpu.matmul %8, %9, %cst_10 {dimension_numbers = #tpu.dot_dimension_numbers<[1], [0], [0], [1], [0, 0, 1, 1], [], []>} : vector<16x256xbf16>, vector<256x128xbf16>, vector<16x128xf32> -> vector<16x128xf32>
    %12 = vector.broadcast %10 : vector<1x128xf32> to vector<16x128xf32>
    %13 = arith.addf %11, %12 : vector<16x128xf32>
    %cst_11 = arith.constant 0.000000e+00 : f32
    %14 = vector.broadcast %cst_11 : f32 to vector<16x128xf32>
    %15 = arith.maximumf %13, %14 : vector<16x128xf32>
    %16 = arith.truncf %15 : vector<16x128xf32> to vector<16x128xbf16>
    %c0_12 = arith.constant 0 : index
    %c0_13 = arith.constant 0 : index
    %17 = vector.load %arg6[%c0_12, %c0_13] : memref<128x64xbf16, #tpu.memory_space<vmem>>, vector<128x64xbf16>
    %c0_14 = arith.constant 0 : index
    %c0_15 = arith.constant 0 : index
    %18 = vector.load %arg7[%c0_14, %c0_15] : memref<1x64xf32, #tpu.memory_space<vmem>>, vector<1x64xf32>
    %cst_16 = arith.constant dense<0.000000e+00> : vector<16x64xf32>
    %19 = tpu.matmul %16, %17, %cst_16 {dimension_numbers = #tpu.dot_dimension_numbers<[1], [0], [0], [1], [0, 0, 1, 1], [], []>} : vector<16x128xbf16>, vector<128x64xbf16>, vector<16x64xf32> -> vector<16x64xf32>
    %20 = vector.broadcast %18 : vector<1x64xf32> to vector<16x64xf32>
    %21 = arith.addf %19, %20 : vector<16x64xf32>
    %cst_17 = arith.constant 0.000000e+00 : f32
    %22 = vector.broadcast %cst_17 : f32 to vector<16x64xf32>
    %23 = arith.maximumf %21, %22 : vector<16x64xf32>
    %24 = arith.truncf %23 : vector<16x64xf32> to vector<16x64xbf16>
    %c0_18 = arith.constant 0 : index
    %c0_19 = arith.constant 0 : index
    %25 = vector.load %arg8[%c0_18, %c0_19] : memref<64x16xbf16, #tpu.memory_space<vmem>>, vector<64x16xbf16>
    %c0_20 = arith.constant 0 : index
    %c0_21 = arith.constant 0 : index
    %26 = vector.load %arg9[%c0_20, %c0_21] : memref<1x16xf32, #tpu.memory_space<vmem>>, vector<1x16xf32>
    %cst_22 = arith.constant dense<0.000000e+00> : vector<16x16xf32>
    %27 = tpu.matmul %24, %25, %cst_22 {dimension_numbers = #tpu.dot_dimension_numbers<[1], [0], [0], [1], [0, 0, 1, 1], [], []>} : vector<16x64xbf16>, vector<64x16xbf16>, vector<16x16xf32> -> vector<16x16xf32>
    %28 = vector.broadcast %26 : vector<1x16xf32> to vector<16x16xf32>
    %29 = arith.addf %27, %28 : vector<16x16xf32>
    %cst_23 = arith.constant 0.000000e+00 : f32
    %30 = vector.broadcast %cst_23 : f32 to vector<16x16xf32>
    %31 = arith.maximumf %29, %30 : vector<16x16xf32>
    %32 = arith.truncf %31 : vector<16x16xf32> to vector<16x16xbf16>
    %c0_24 = arith.constant 0 : index
    %c0_25 = arith.constant 0 : index
    %33 = vector.load %arg10[%c0_24, %c0_25] : memref<16x2xbf16, #tpu.memory_space<vmem>>, vector<16x2xbf16>
    %c0_26 = arith.constant 0 : index
    %c0_27 = arith.constant 0 : index
    %34 = vector.load %arg11[%c0_26, %c0_27] : memref<1x2xf32, #tpu.memory_space<vmem>>, vector<1x2xf32>
    %cst_28 = arith.constant dense<0.000000e+00> : vector<16x2xf32>
    %35 = tpu.matmul %32, %33, %cst_28 {dimension_numbers = #tpu.dot_dimension_numbers<[1], [0], [0], [1], [0, 0, 1, 1], [], []>} : vector<16x16xbf16>, vector<16x2xbf16>, vector<16x2xf32> -> vector<16x2xf32>
    %36 = vector.broadcast %34 : vector<1x2xf32> to vector<16x2xf32>
    %37 = arith.addf %35, %36 : vector<16x2xf32>
    %cst_29 = arith.constant 0.000000e+00 : f32
    %38 = vector.broadcast %cst_29 : f32 to vector<16x2xf32>
    %39 = arith.maximumf %37, %38 : vector<16x2xf32>
    %40 = arith.truncf %39 : vector<16x2xf32> to vector<16x2xbf16>
    %c0_30 = arith.constant 0 : index
    %c0_31 = arith.constant 0 : index
    %41 = vector.load %arg12[%c0_30, %c0_31] : memref<2x16xbf16, #tpu.memory_space<vmem>>, vector<2x16xbf16>
    %c0_32 = arith.constant 0 : index
    %c0_33 = arith.constant 0 : index
    %42 = vector.load %arg13[%c0_32, %c0_33] : memref<1x16xf32, #tpu.memory_space<vmem>>, vector<1x16xf32>
    %cst_34 = arith.constant dense<0.000000e+00> : vector<16x16xf32>
    %43 = tpu.matmul %40, %41, %cst_34 {dimension_numbers = #tpu.dot_dimension_numbers<[1], [0], [0], [1], [0, 0, 1, 1], [], []>} : vector<16x2xbf16>, vector<2x16xbf16>, vector<16x16xf32> -> vector<16x16xf32>
    %44 = vector.broadcast %42 : vector<1x16xf32> to vector<16x16xf32>
    %45 = arith.addf %43, %44 : vector<16x16xf32>
    %c0_35 = arith.constant 0 : index
    %c0_36 = arith.constant 0 : index
    %46 = vector.load %arg14[%c0_35, %c0_36] : memref<16x16xf32, #tpu.memory_space<vmem>>, vector<16x16xf32>
    tpu.vector_store %arg14[%c0_35, %c0_36], %45 {strides = array<i32>} : memref<16x16xf32, #tpu.memory_space<vmem>>, vector<16x16xf32>,
    return
  }
  func.func @transform_0(%arg0: i32) -> (i32, i32) {
    %c0_i32 = arith.constant 0 : i32
    %c0_i32_0 = arith.constant 0 : i32
    return %arg0, %c0_i32 : i32, i32
  }
  func.func @transform_1(%arg0: i32) -> (i32, i32) {
    %c0_i32 = arith.constant 0 : i32
    %c0_i32_0 = arith.constant 0 : i32
    %c0_i32_1 = arith.constant 0 : i32
    return %c0_i32, %c0_i32_0 : i32, i32
  }
  func.func @transform_2(%arg0: i32) -> (i32, i32) {
    %c0_i32 = arith.constant 0 : i32
    %c0_i32_0 = arith.constant 0 : i32
    %c0_i32_1 = arith.constant 0 : i32
    return %c0_i32, %c0_i32_0 : i32, i32
  }
  func.func @transform_3(%arg0: i32) -> (i32, i32) {
    %c0_i32 = arith.constant 0 : i32
    %c0_i32_0 = arith.constant 0 : i32
    %c0_i32_1 = arith.constant 0 : i32
    return %c0_i32, %c0_i32_0 : i32, i32
  }
  func.func @transform_4(%arg0: i32) -> (i32, i32) {
    %c0_i32 = arith.constant 0 : i32
    %c0_i32_0 = arith.constant 0 : i32
    %c0_i32_1 = arith.constant 0 : i32
    return %c0_i32, %c0_i32_0 : i32, i32
  }
  func.func @transform_5(%arg0: i32) -> (i32, i32) {
    %c0_i32 = arith.constant 0 : i32
    %c0_i32_0 = arith.constant 0 : i32
    %c0_i32_1 = arith.constant 0 : i32
    return %c0_i32, %c0_i32_0 : i32, i32
  }
  func.func @transform_6(%arg0: i32) -> (i32, i32) {
    %c0_i32 = arith.constant 0 : i32
    %c0_i32_0 = arith.constant 0 : i32
    %c0_i32_1 = arith.constant 0 : i32
    return %c0_i32, %c0_i32_0 : i32, i32
  }
  func.func @transform_7(%arg0: i32) -> (i32, i32) {
    %c0_i32 = arith.constant 0 : i32
    %c0_i32_0 = arith.constant 0 : i32
    %c0_i32_1 = arith.constant 0 : i32
    return %c0_i32, %c0_i32_0 : i32, i32
  }
  func.func @transform_8(%arg0: i32) -> (i32, i32) {
    %c0_i32 = arith.constant 0 : i32
    %c0_i32_0 = arith.constant 0 : i32
    %c0_i32_1 = arith.constant 0 : i32
    return %c0_i32, %c0_i32_0 : i32, i32
  }
  func.func @transform_9(%arg0: i32) -> (i32, i32) {
    %c0_i32 = arith.constant 0 : i32
    %c0_i32_0 = arith.constant 0 : i32
    %c0_i32_1 = arith.constant 0 : i32
    return %c0_i32, %c0_i32_0 : i32, i32
  }
  func.func @transform_10(%arg0: i32) -> (i32, i32) {
    %c0_i32 = arith.constant 0 : i32
    %c0_i32_0 = arith.constant 0 : i32
    %c0_i32_1 = arith.constant 0 : i32
    return %c0_i32, %c0_i32_0 : i32, i32
  }
  func.func @transform_11(%arg0: i32) -> (i32, i32) {
    %c0_i32 = arith.constant 0 : i32
    %c0_i32_0 = arith.constant 0 : i32
    %c0_i32_1 = arith.constant 0 : i32
    return %c0_i32, %c0_i32_0 : i32, i32
  }
  func.func @transform_12(%arg0: i32) -> (i32, i32) {
    %c0_i32 = arith.constant 0 : i32
    %c0_i32_0 = arith.constant 0 : i32
    %c0_i32_1 = arith.constant 0 : i32
    return %c0_i32, %c0_i32_0 : i32, i32
  }
  func.func @transform_13(%arg0: i32) -> (i32, i32) {
    %c0_i32 = arith.constant 0 : i32
    %c0_i32_0 = arith.constant 0 : i32
    return %arg0, %c0_i32 : i32, i32
  }
}

</mosaic_0001>

<bundles_post_ra>
// kernel: tpu_custom_call.1
= control target key start
LH: loop header
LB: loop body
LE: loop exit
PB: predicated region body
PF: predicated region fallthrough
CT: control target
= control target key end

     0   :  { %18 = vsyncpa [#allocation3], 0  ;;  %s1721_s0 = inlined_call_operand.hbm [shape: bf16[16,384], index: 0, kind: input, shape index: {}]   ;;  %s1722_s1 = inlined_call_operand.hbm [shape: bf16[384,256], index: 1, kind: input, shape index: {}]   ;;  %s1723_s2 = inlined_call_operand.hbm [shape: f32[1,256], index: 2, kind: input, shape index: {}]   ;;  %s1724_s3 = inlined_call_operand.vmem [shape: bf16[256,128], index: 3, kind: input, shape index: {}]   ;;  %s1725_s4 = inlined_call_operand.hbm [shape: f32[1,128], index: 4, kind: input, shape index: {}]   ;;  %s1726_s5 = inlined_call_operand.vmem [shape: bf16[128,64], index: 5, kind: input, shape index: {}]   ;;  %s1727_s6 = inlined_call_operand.vmem [shape: f32[1,64], index: 6, kind: input, shape index: {}]   ;;  %s1728_s7 = inlined_call_operand.vmem [shape: bf16[64,16], index: 7, kind: input, shape index: {}]   ;;  %s1729_s8 = inlined_call_operand.vmem [shape: f32[1,16], index: 8, kind: input, shape index: {}]   ;;  %s1730_s9 = inlined_call_operand.vmem [shape: bf16[16,2], index: 9, kind: input, shape index: {}]   ;;  %s1731_s10 = inlined_call_operand.vmem [shape: f32[1,2], index: 10, kind: input, shape index: {}]   ;;  %s1732_s11 = inlined_call_operand.vmem [shape: bf16[2,16], index: 11, kind: input, shape index: {}]   ;;  %s1733_s12 = inlined_call_operand.vmem [shape: f32[1,16], index: 12, kind: input, shape index: {}]   ;;  %s1734_s13 = inlined_call_operand.hbm [shape: f32[16,16], index: 13, kind: output, shape index: {}]  }
   0x1   :  { %19 = vsyncpa [#allocation6], 0 }
   0x2   :  { %20 = vsyncpa [#allocation9], 0 }
   0x3   :  { %21 = vsyncpa [#allocation4], 0  ;;  %s1446_s25 = smov [#allocation5]   ;;  %s1328_s29 = scalar_lea.hbm %s1722_s1, 6144 }
   0x4   :  { %s39_s26 = sshll.u32 %s1446_s25, 4  ;;  %p1329_p0 = scmp.ne.s32.totalorder %s1722_s1, %s1328_s29  ;;  %s40_s26 = int_to_ptr.vmem [resolvable:$true] %s39_s26 }
   0x5   :  { %p1332_p1 = scmp.lt.u32.totalorder %s1328_s29, %s1722_s1 }
   0x7   :  { %p1334_p2 = pnand %p1332_p1, %p1329_p0 }
   0x9   :  { %1337 = shalt.err (!%p1334_p2)
}
   0xa   :  { %s1338_s17 = scalar_lea.vmem %s40_s26, 6144  ;;  %p1343_p4 = scmp.lt.s32.totalorder %s40_s26, %s40_s26 }
   0xb   :  { %p1339_p3 = scmp.ne.s32.totalorder %s40_s26, %s1338_s17  ;;  %p1344_p5 = scmp.lt.s32.totalorder %s1338_s17, %s1338_s17 }
   0xd   :  { %p1345_p6 = por %p1344_p5, %p1343_p4 }
   0xf   :  { %p1346_p7 = pnand %p1345_p6, %p1339_p3 }
  0x11   :  { %1349 = shalt.err (!%p1346_p7)
}
  0x12   :  { %s1447_s18 = smov 128   ;;  %s1448_s19 = smov 8  }
  0x13   :  { %45 = dma.hbm_to_vmem [thread:$0]  %s1722_s1, 6144, %s40_s26, [#allocation6], %s1447_s18, %s1447_s18, %s1448_s19  }
  0x14   :  { %s1449_s22 = smov [#allocation2]   ;;  %s1350_s27 = scalar_lea.hbm %s1721_s0, 384 }
  0x15   :  { %s27_s23 = sshll.u32 %s1449_s22, 4  ;;  %p1351_p8 = scmp.ne.s32.totalorder %s1721_s0, %s1350_s27  ;;  %s28_s23 = int_to_ptr.vmem [resolvable:$true] %s27_s23 }
  0x16   :  { %p1354_p9 = scmp.lt.u32.totalorder %s1350_s27, %s1721_s0 }
  0x18   :  { %p1356_p10 = pnand %p1354_p9, %p1351_p8 }
  0x1a   :  { %1359 = shalt.err (!%p1356_p10)
}
  0x1b   :  { %s1360_s15 = scalar_lea.vmem %s28_s23, 384  ;;  %p1365_p12 = scmp.lt.s32.totalorder %s28_s23, %s28_s23 }
  0x1c   :  { %p1361_p11 = scmp.ne.s32.totalorder %s28_s23, %s1360_s15  ;;  %p1366_p13 = scmp.lt.s32.totalorder %s1360_s15, %s1360_s15 }
  0x1e   :  { %p1367_p0 = por %p1366_p13, %p1365_p12 }
  0x20   :  { %p1368_p1 = pnand %p1367_p0, %p1361_p11 }
  0x22   :  { %1371 = shalt.err (!%p1368_p1)
}
  0x23   :  { %s1450_s1 = smov 192   ;;  %s1451_s26 = smov 12  }
  0x24   :  { %33 = dma.hbm_to_vmem [thread:$0]  %s1721_s0, 384, %s28_s23, [#allocation3], %s1450_s1, %s1450_s1, %s1451_s26  }
  0x25   :  { %s1452_s20 = smov [#allocation7]   ;;  %s1453_s22 = smov [#allocation8]  }
  0x26   :  { %s52_s21 = sshll.u32 %s1452_s20, 4  ;;  %s64_s24 = sshll.u32 %s1453_s22, 4  ;;  %s53_s21 = int_to_ptr.vmem [resolvable:$true] %s52_s21  ;;  %s65_s24 = int_to_ptr.vmem [resolvable:$true] %s64_s24 }
  0x27   :  { %s1372_s28 = scalar_lea.hbm %s1723_s2, 32 }
  0x28   :  { %p1373_p2 = scmp.ne.s32.totalorder %s1723_s2, %s1372_s28  ;;  %p1376_p3 = scmp.lt.u32.totalorder %s1372_s28, %s1723_s2 }
  0x2a   :  { %p1378_p4 = pnand %p1376_p3, %p1373_p2 }
  0x2c   :  { %1381 = shalt.err (!%p1378_p4)
}
  0x2d   :  { %s1382_s0 = scalar_lea.vmem %s53_s21, 32  ;;  %p1387_p6 = scmp.lt.s32.totalorder %s53_s21, %s53_s21 }
  0x2e   :  { %p1383_p5 = scmp.ne.s32.totalorder %s53_s21, %s1382_s0  ;;  %p1388_p7 = scmp.lt.s32.totalorder %s1382_s0, %s1382_s0 }
  0x30   :  { %p1389_p8 = por %p1388_p7, %p1387_p6 }
  0x32   :  { %p1390_p9 = pnand %p1389_p8, %p1383_p5 }
  0x34   :  { %1393 = shalt.err (!%p1390_p9)
}
  0x35   :  { %55 = dma.hbm_to_vmem [thread:$0]  %s1723_s2, 32, %s53_s21, [#allocation6]  }
  0x36   :  { %s1394_s17 = scalar_lea.hbm %s1725_s4, 16 }
  0x37   :  { %p1395_p10 = scmp.ne.s32.totalorder %s1725_s4, %s1394_s17  ;;  %p1398_p11 = scmp.lt.u32.totalorder %s1394_s17, %s1725_s4 }
  0x39   :  { %p1400_p12 = pnand %p1398_p11, %p1395_p10 }
  0x3b   :  { %1403 = shalt.err (!%p1400_p12)
}
  0x3c   :  { %s1404_s28 = scalar_lea.vmem %s65_s24, 16  ;;  %s1408_s29 = scalar_lea.vmem %s65_s24, 32 }
  0x3d   :  { %p1405_p13 = scmp.ne.s32.totalorder %s65_s24, %s1404_s28  ;;  %p1409_p0 = scmp.lt.s32.totalorder %s65_s24, %s65_s24 }
  0x3e   :  { %p1410_p1 = scmp.lt.s32.totalorder %s1408_s29, %s1404_s28 }
  0x40   :  { %p1411_p2 = por %p1410_p1, %p1409_p0 }
  0x42   :  { %p1412_p3 = pnand %p1411_p2, %p1405_p13 }
  0x44   :  { %1415 = shalt.err (!%p1412_p3)
}
  0x45   :  { %67 = dma.hbm_to_vmem [thread:$0]  %s1725_s4, 16, %s65_s24, [#allocation9]  }
  0x46   :  { %1438 = dma.done.wait [#allocation3], 384  }
  0x47   :  { %1439 = vsyncadd [#allocation3], 4294966912 }
  0x48   :  { %1440 = dma.done.wait [#allocation6], 6176  }
  0x49   :  { %1441 = vsyncadd [#allocation6], 4294961120 }
  0x4a   :  { %1442 = dma.done.wait [#allocation9], 16  }
  0x4b   :  { %1443 = vsyncadd [#allocation9], 4294967280  ;;  %v1223_v0 = vld [vmem:[#allocation5 + $0x4] ss:$8 sps:$4 sm:$0xff]   ;;  %v1225_v1 = vld [vmem:[#allocation5] ss:$8 sps:$4 sm:$0xff]  }
  0x4c   :  { %417 = vmatprep.subr.bf16.mxu0 %v1223_v0  ;;  %v1226_v2 = vld [vmem:[#allocation5 + $0x14] ss:$8 sps:$4 sm:$0xff]   ;;  %v1228_v3 = vld [vmem:[#allocation5 + $0x10] ss:$8 sps:$4 sm:$0xff]   ;;  %v1229_v4 = vld [vmem:[#allocation5 + $0x24] ss:$8 sps:$4 sm:$0xff]  }
  0x4d   :  { %418 = vmatpush1.bf16.msra.mxu0 %v1225_v1  ;;  %v1231_v5 = vld [vmem:[#allocation5 + $0x20] ss:$8 sps:$4 sm:$0xff]   ;;  %v1232_v6 = vld [vmem:[#allocation5 + $0x34] ss:$8 sps:$4 sm:$0xff]   ;;  %v1234_v7 = vld [vmem:[#allocation5 + $0x30] ss:$8 sps:$4 sm:$0xff]  }
  0x4e   :  { %419 = vmatprep.subr.bf16.mxu0 %v1226_v2  ;;  %v1235_v8 = vld [vmem:[#allocation5 + $0x44] ss:$8 sps:$4 sm:$0xff]   ;;  %v1237_v9 = vld [vmem:[#allocation5 + $0x40] ss:$8 sps:$4 sm:$0xff]   ;;  %v1238_v10 = vld [vmem:[#allocation5 + $0x54] ss:$8 sps:$4 sm:$0xff]  }
  0x4f   :  { %v1240_v11 = vld [vmem:[#allocation5 + $0x50] ss:$8 sps:$4 sm:$0xff]   ;;  %v1241_v12 = vld [vmem:[#allocation5 + $0x64] ss:$8 sps:$4 sm:$0xff]   ;;  %v1243_v14 = vld [vmem:[#allocation5 + $0x60] ss:$8 sps:$4 sm:$0xff]  }
  0x50   :  { %v1273_v13 = vld [vmem:[#allocation2 + $0x4] ss:$12 sps:$4 sm:$0xff]   ;;  %v1244_v15 = vld [vmem:[#allocation5 + $0x74] ss:$8 sps:$4 sm:$0xff]   ;;  %v1249_v18 = vld [vmem:[#allocation5 + $0x80] ss:$8 sps:$4 sm:$0xff]  }
  0x51   :  { %420 = vmatpush1.bf16.msra.mxu0 %v1228_v3  ;;  %449 = vmatprep.mubr.bf16.mxu0 %v1273_v13  ;;  %v1246_v16 = vld [vmem:[#allocation5 + $0x70] ss:$8 sps:$4 sm:$0xff]   ;;  %v1247_v17 = vld [vmem:[#allocation5 + $0x84] ss:$8 sps:$4 sm:$0xff]   ;;  %v1250_v19 = vld [vmem:[#allocation5 + $0x94] ss:$8 sps:$4 sm:$0xff]  }
  0x52   :  { %421 = vmatprep.subr.bf16.mxu0 %v1229_v4  ;;  %v1252_v20 = vld [vmem:[#allocation5 + $0x90] ss:$8 sps:$4 sm:$0xff]   ;;  %v1253_v21 = vld [vmem:[#allocation5 + $0xa4] ss:$8 sps:$4 sm:$0xff]   ;;  %v1255_v24 = vld [vmem:[#allocation5 + $0xa0] ss:$8 sps:$4 sm:$0xff]  }
  0x53   :  { %v1299_v22 = vld [vmem:[%s1724_s3 + $0x40] sm:$0xff]   ;;  %v1301_v25 = vld [vmem:[%s1724_s3 + $0x48] sm:$0xff]   ;;  %v1303_v27 = vld [vmem:[%s1724_s3 + $0x50] sm:$0xff]   ;;  %v1454_v49 = vmov 0   ;;  %v1455_v4 = vmov 0.0   ;;  %vm1456_vm0 = vmmov 0  }
  0x54   :  { %v1300_v23 = vld [vmem:[%s1724_s3] sm:$0xff]   ;;  %1119 = vmatprep.subr.bf16.mxu1 %v1299_v22  ;;  %v1302_v26 = vld [vmem:[%s1724_s3 + $0x8] sm:$0xff]   ;;  %v1304_v30 = vld [vmem:[%s1724_s3 + $0x10] sm:$0xff]   ;;  %vm842_vm1 = vcmask 523264   ;;  %vm905_vm2 = vcmask 130048   ;;  %vm965_vm3 = vcmask 1040384  }
  0x55   :  { %422 = vmatpush1.bf16.msra.mxu0 %v1231_v5  ;;  %1120 = vmatpush3.bf16.msra.mxu1 %v1300_v23  ;;  %v1256_v28 = vld [vmem:[#allocation5 + $0xb4] ss:$8 sps:$4 sm:$0xff]   ;;  %v1258_v29 = vld [vmem:[#allocation5 + $0xb0] ss:$8 sps:$4 sm:$0xff]   ;;  %v1305_v31 = vld [vmem:[%s1724_s3 + $0x58] sm:$0xff]   ;;  %v151_v5 = vlaneseq  ;;  %vm961_vm4 = vcmask 15360  }
  0x56   :  { %423 = vmatprep.subr.bf16.mxu0 %v1232_v6  ;;  %1121 = vmatprep.subr.bf16.mxu1 %v1301_v25  ;;  %v1259_v32 = vld [vmem:[#allocation5 + $0xc4] ss:$8 sps:$4 sm:$0xff]   ;;  %v1261_v33 = vld [vmem:[#allocation5 + $0xc0] ss:$8 sps:$4 sm:$0xff]   ;;  %v1262_v36 = vld [vmem:[#allocation5 + $0xd4] ss:$8 sps:$4 sm:$0xff]  }
  0x57   :  { %v1306_v34 = vld [vmem:[%s1724_s3 + $0x18] sm:$0xff]   ;;  %v1307_v35 = vld [vmem:[%s1724_s3 + $0x60] sm:$0xff]   ;;  %v1264_v38 = vld [vmem:[#allocation5 + $0xd0] ss:$8 sps:$4 sm:$0xff]   ;;  %v152_v6 = vshrl.u32 %v151_v5, 7  ;;  %s1457_s14 = smov [#allocation10]  }
  0x58   :  { %v1308_v37 = vld [vmem:[%s1724_s3 + $0x20] sm:$0xff]   ;;  %v1309_v39 = vld [vmem:[%s1724_s3 + $0x68] sm:$0xff]   ;;  %v1311_v0 = vld [vmem:[%s1724_s3 + $0x70] sm:$0xff]   ;;  %s1017_s15 = sshll.u32 %s1457_s14, 4  ;;  %s1018_s15 = int_to_ptr.vmem [resolvable:$true] %s1017_s15 }
  0x59   :  { %424 = vmatpush1.bf16.msra.mxu0 %v1234_v7  ;;  %1122 = vmatpush3.bf16.msra.mxu1 %v1302_v26  ;;  %v1265_v40 = vld [vmem:[#allocation5 + $0xe4] ss:$8 sps:$4 sm:$0xff]   ;;  %v1267_v41 = vld [vmem:[#allocation5 + $0xe0] ss:$8 sps:$4 sm:$0xff]   ;;  %v1268_v42 = vld [vmem:[#allocation5 + $0xf4] ss:$8 sps:$4 sm:$0xff]   ;;  %p1421_p5 = scmp.lt.s32.totalorder %s1018_s15, %s1018_s15 }
  0x5a   :  { %425 = vmatprep.subr.bf16.mxu0 %v1235_v8  ;;  %1123 = vmatprep.subr.bf16.mxu1 %v1303_v27  ;;  %v1270_v43 = vld [vmem:[#allocation5 + $0xf0] ss:$8 sps:$4 sm:$0xff]   ;;  %v1276_v44 = vld [vmem:[#allocation5 + $0x104] ss:$8 sps:$4 sm:$0xff]   ;;  %v1271_v45 = vld [vmem:[#allocation2] ss:$12 sps:$4 sm:$0xff]  }
  0x5b   :  { %v1274_v46 = vld [vmem:[#allocation5 + $0x100] ss:$8 sps:$4 sm:$0xff]   ;;  %v1279_v47 = vld [vmem:[#allocation5 + $0x114] ss:$8 sps:$4 sm:$0xff]   ;;  %v1277_v48 = vld [vmem:[#allocation5 + $0x110] ss:$8 sps:$4 sm:$0xff]  }
  0x5c   :  { %v1282_v50 = vld [vmem:[#allocation5 + $0x124] ss:$8 sps:$4 sm:$0xff]   ;;  %v1280_v51 = vld [vmem:[#allocation5 + $0x120] ss:$8 sps:$4 sm:$0xff]   ;;  %v1285_v52 = vld [vmem:[#allocation5 + $0x134] ss:$8 sps:$4 sm:$0xff]  }
  0x5d   :  { %426 = vmatpush1.bf16.msra.mxu0 %v1237_v9  ;;  %1124 = vmatpush3.bf16.msra.mxu1 %v1304_v30  ;;  %v1283_v53 = vld [vmem:[#allocation5 + $0x130] ss:$8 sps:$4 sm:$0xff]   ;;  %v1288_v54 = vld [vmem:[#allocation5 + $0x144] ss:$8 sps:$4 sm:$0xff]   ;;  %v1286_v55 = vld [vmem:[#allocation5 + $0x140] ss:$8 sps:$4 sm:$0xff]  }
  0x5e   :  { %427 = vmatprep.subr.bf16.mxu0 %v1238_v10  ;;  %1125 = vmatprep.subr.bf16.mxu1 %v1305_v31  ;;  %v1291_v56 = vld [vmem:[#allocation5 + $0x154] ss:$8 sps:$4 sm:$0xff]   ;;  %v1289_v57 = vld [vmem:[#allocation5 + $0x150] ss:$8 sps:$4 sm:$0xff]   ;;  %v1294_v58 = vld [vmem:[#allocation5 + $0x164] ss:$8 sps:$4 sm:$0xff]  }
  0x5f   :  { %v1292_v59 = vld [vmem:[#allocation5 + $0x160] ss:$8 sps:$4 sm:$0xff]   ;;  %v1297_v60 = vld [vmem:[#allocation5 + $0x174] ss:$8 sps:$4 sm:$0xff]   ;;  %v1295_v61 = vld [vmem:[#allocation5 + $0x170] ss:$8 sps:$4 sm:$0xff]  }
  0x60   :  { %v1298_v62 = vld [vmem:[#allocation2 + $0x8] ss:$12 sps:$4 sm:$0xff]   ;;  %v1313_v2 = vld [vmem:[%s1724_s3 + $0x78] sm:$0xff]   ;;  %v153_v7 = vsub.s32 0, %v152_v6  ;;  %v157_v9 = vsub.s32 1, %v152_v6  ;;  %v1315_v26 = vld [vmem:[%s1726_s5] sm:$0xff]  }
  0x61   :  { %428 = vmatpush1.bf16.msra.mxu0 %v1240_v11  ;;  %1126 = vmatpush3.bf16.msra.mxu1 %v1306_v34  ;;  %v1310_v63 = vld [vmem:[%s1724_s3 + $0x28] sm:$0xff]   ;;  %v1312_v1 = vld [vmem:[%s1724_s3 + $0x30] sm:$0xff]   ;;  %v1314_v3 = vld [vmem:[%s1724_s3 + $0x38] sm:$0xff]  }
  0x62   :  { %429 = vmatprep.subr.bf16.mxu0 %v1241_v12  ;;  %1127 = vmatprep.subr.bf16.mxu1 %v1307_v35  ;;  %v149_v8 = vld [vmem:[#allocation7] sm:$0x3]  ;;  %v1316_v27 = vld [vmem:[%s1726_s5 + $0x8] sm:$0xff]   ;;  %v1319_v30 = vld [vmem:[%s1726_s5 + $0x20] sm:$0xff]  }
  0x63   :  { %v154_v10 = vrot.slane %v149_v8, %v153_v7  ;;  %v158_v11 = vrot.slane %v149_v8, %v157_v9  ;;  %v1320_v31 = vld [vmem:[%s1726_s5 + $0x28] sm:$0xff]   ;;  %v1082_v35 = vld [vmem:[#allocation8] ss:$0 sm:$0xff]  ;;  %v953_v8 = vld [vmem:[%s1732_s11] sm:$0x1] }
  0x64   :  { %v967_v9 = vsel %vm965_vm3, %v953_v8, 0 }
  0x65   :  { %430 = vmatpush1.bf16.msra.mxu0 %v1243_v14  ;;  %1128 = vmatpush3.bf16.msra.mxu1 %v1308_v37 }
  0x66   :  { %431 = vmatprep.subr.bf16.mxu0 %v1244_v15  ;;  %1129 = vmatprep.subr.bf16.mxu1 %v1309_v39 }
  0x69   :  { %432 = vmatpush1.bf16.msra.mxu0 %v1246_v16  ;;  %1130 = vmatpush3.bf16.msra.mxu1 %v1310_v63 }
  0x6a   :  { %433 = vmatprep.subr.bf16.mxu0 %v1247_v17  ;;  %1131 = vmatprep.subr.bf16.mxu1 %v1311_v0 }
  0x6d   :  { %434 = vmatpush1.bf16.msra.mxu0 %v1249_v18  ;;  %1132 = vmatpush3.bf16.msra.mxu1 %v1312_v1 }
  0x6e   :  { %435 = vmatprep.subr.bf16.mxu0 %v1250_v19  ;;  %1133 = vmatprep.subr.bf16.mxu1 %v1313_v2 }
  0x71   :  { %436 = vmatpush1.bf16.msra.mxu0 %v1252_v20  ;;  %1134 = vmatpush3.bf16.msra.mxu1 %v1314_v3 }
  0x72   :  { %437 = vmatprep.subr.bf16.mxu0 %v1253_v21  ;;  %1159 = vmatprep.subr.bf16.mxu1 %v1455_v4 }
  0x75   :  { %438 = vmatpush1.bf16.msra.mxu0 %v1255_v24 }
  0x76   :  { %439 = vmatprep.subr.bf16.mxu0 %v1256_v28  ;;  %v1317_v28 = vld [vmem:[%s1726_s5 + $0x10] sm:$0xff]  }
  0x79   :  { %440 = vmatpush1.bf16.msra.mxu0 %v1258_v29  ;;  %v1318_v29 = vld [vmem:[%s1726_s5 + $0x18] sm:$0xff]  }
  0x7a   :  { %441 = vmatprep.subr.bf16.mxu0 %v1259_v32  ;;  %v1321_v32 = vld [vmem:[%s1726_s5 + $0x30] sm:$0xff]  }
  0x7d   :  { %442 = vmatpush1.bf16.msra.mxu0 %v1261_v33  ;;  %v1322_v33 = vld [vmem:[%s1726_s5 + $0x38] sm:$0xff]  }
  0x7e   :  { %443 = vmatprep.subr.bf16.mxu0 %v1262_v36 }
  0x81   :  { %444 = vmatpush1.bf16.msra.mxu0 %v1264_v38 }
  0x82   :  { %445 = vmatprep.subr.bf16.mxu0 %v1265_v40 }
  0x85   :  { %446 = vmatpush1.bf16.msra.mxu0 %v1267_v41 }
  0x86   :  { %447 = vmatprep.subr.bf16.mxu0 %v1268_v42 }
  0x89   :  { %448 = vmatpush1.bf16.msra.mxu0 %v1270_v43 }
  0x8a   :  { %460 = vmatprep.subr.bf16.mxu0 %v1276_v44 }
  0x8c   :  { %450 = vmatmul.mubr.bf16.vlgmr.msra.gmra.mrb[0].mxu0 %v1271_v45  ;;  %v1323_v45 = vld [vmem:[%s1728_s7] sm:$0xff]  }
  0x8d   :  { %461 = vmatpush1.bf16.msra.mxu0 %v1274_v46  ;;  %492 = vmatprep.mubr.bf16.mxu0 %v1454_v49  ;;  %v1326_v49 = vld [vmem:[%s1728_s7 + $0x18] sm:$0xff]  }
  0x8e   :  { %462 = vmatprep.subr.bf16.mxu0 %v1279_v47  ;;  %v1324_v47 = vld [vmem:[%s1728_s7 + $0x8] sm:$0xff]  }
  0x91   :  { %463 = vmatpush1.bf16.msra.mxu0 %v1277_v48  ;;  %v1325_v48 = vld [vmem:[%s1728_s7 + $0x10] sm:$0xff]  }
  0x92   :  { %464 = vmatprep.subr.bf16.mxu0 %v1282_v50  ;;  %v1099_v50 = vld [vmem:[%s1727_s6] ss:$0 sm:$0xff] }
  0x95   :  { %465 = vmatpush1.bf16.msra.mxu0 %v1280_v51 }
  0x96   :  { %466 = vmatprep.subr.bf16.mxu0 %v1285_v52 }
  0x99   :  { %467 = vmatpush1.bf16.msra.mxu0 %v1283_v53 }
  0x9a   :  { %468 = vmatprep.subr.bf16.mxu0 %v1288_v54 }
  0x9d   :  { %469 = vmatpush1.bf16.msra.mxu0 %v1286_v55 }
  0x9e   :  { %470 = vmatprep.subr.bf16.mxu0 %v1291_v56 }
  0xa1   :  { %471 = vmatpush1.bf16.msra.mxu0 %v1289_v57 }
  0xa2   :  { %472 = vmatprep.subr.bf16.mxu0 %v1294_v58 }
  0xa5   :  { %473 = vmatpush1.bf16.msra.mxu0 %v1292_v59 }
  0xa6   :  { %474 = vmatprep.subr.bf16.mxu0 %v1297_v60  ;;  %v1327_v60 = vld [vmem:[%s1730_s9] sm:$0xff]  }
  0xa9   :  { %475 = vmatpush1.bf16.msra.mxu0 %v1295_v61  ;;  %v1108_v61 = vld [vmem:[%s1729_s8] ss:$0 sm:$0xff] }
  0xac   :  { %493 = vmatmul.mubr.bf16.vlgmr.msra.gmra.mrb[0].mxu0 %v1298_v62 }
 0x17f   :  { %v494_v12 = vpop.f32.mrb[0].mxu0 }
 0x180   :  { %v1203_v13 = vadd.f32 %v494_v12, %v154_v10  ;;  %v496_v14 = vpop.f32.mrb[1].mxu0 }
 0x181   :  { %v1204_v15 = vadd.f32 %v496_v14, %v158_v11  ;;  %v498_v16 = vpop.f32.mrb[2].mxu0 }
 0x182   :  { %v1205_v17 = vadd.f32 %v498_v16, %v154_v10  ;;  %v500_v18 = vpop.f32.mrb[3].mxu0  ;;  %v503_v20 = vmax.f32 %v1203_v13, 0.0  ;;  %v1114_v10 = vld [vmem:[%s1731_s10] ss:$0 sm:$0xff]  ;;  %s1416_s10 = scalar_lea.vmem %s1018_s15, 256 }
 0x183   :  { %v1206_v19 = vadd.f32 %v500_v18, %v158_v11  ;;  %v504_v22 = vmax.f32 %v1204_v15, 0.0  ;;  %p1417_p4 = scmp.ne.s32.totalorder %s1018_s15, %s1416_s10  ;;  %p1422_p6 = scmp.lt.s32.totalorder %s1416_s10, %s1416_s10 }
 0x184   :  { %v505_v21 = vmax.f32 %v1205_v17, 0.0 }
 0x185   :  { %v506_v23 = vmax.f32 %v1206_v19, 0.0  ;;  %v1117_v19 = vld [vmem:[%s1733_s12] ss:$0 sm:$0xff]  ;;  %p1423_p7 = por %p1422_p6, %p1421_p5 }
 0x186   :  { %v507_v24 = vpack.c.bf16 %v505_v21, %v503_v20 }
 0x187   :  { %v508_v25 = vpack.c.bf16 %v506_v23, %v504_v22  ;;  %p1424_p8 = pnand %p1423_p7, %p1417_p4 }
 0x189   :  { %676 = vmatprep.mubr.bf16.mxu1 %v508_v25 }
 0x18a   :  { %677 = vmatmul.mubr.bf16.vlgmr.msra.gmra.mrb[0].mxu1 %v507_v24 }
 0x18b   :  { %1160 = vmatpush3.bf16.msra.mxu1 %v1315_v26  ;;  %1175 = vmatprep.mubr.msk.bf16.mxu1 %vm1456_vm0, %v1455_v4 }
 0x18c   :  { %1161 = vmatprep.subr.bf16.mxu1 %v1455_v4 }
 0x18f   :  { %1162 = vmatpush3.bf16.msra.mxu1 %v1316_v27 }
 0x190   :  { %1163 = vmatprep.subr.bf16.mxu1 %v1455_v4 }
 0x193   :  { %1164 = vmatpush3.bf16.msra.mxu1 %v1317_v28 }
 0x194   :  { %1165 = vmatprep.subr.bf16.mxu1 %v1455_v4 }
 0x197   :  { %1166 = vmatpush3.bf16.msra.mxu1 %v1318_v29 }
 0x198   :  { %1167 = vmatprep.subr.bf16.mxu1 %v1455_v4 }
 0x19b   :  { %1168 = vmatpush3.bf16.msra.mxu1 %v1319_v30 }
 0x19c   :  { %1169 = vmatprep.subr.bf16.mxu1 %v1455_v4 }
 0x19f   :  { %1170 = vmatpush3.bf16.msra.mxu1 %v1320_v31 }
 0x1a0   :  { %1171 = vmatprep.subr.bf16.mxu1 %v1455_v4 }
 0x1a3   :  { %1172 = vmatpush3.bf16.msra.mxu1 %v1321_v32 }
 0x1a4   :  { %1173 = vmatprep.subr.bf16.mxu1 %v1455_v4 }
 0x1a7   :  { %1174 = vmatpush3.bf16.msra.mxu1 %v1322_v33 }
 0x1a8   :  { %1179 = vmatprep.subr.bf16.mxu1 %v1455_v4 }
 0x25d   :  { %v1135_v34 = vpop.f32.mrb[0].mxu1 }
 0x25e   :  { %v1136_v36 = vpop.f32.mrb[1].mxu1 }
 0x25f   :  { %v1137_v37 = vadd.f32 %v1136_v36, %v1135_v34  ;;  %v1138_v38 = vpop.f32.mrb[2].mxu1 }
 0x260   :  { %v1139_v39 = vpop.f32.mrb[3].mxu1 }
 0x261   :  { %v679_v40 = vadd.f32 %v1137_v37, %v1082_v35  ;;  %v1140_v41 = vadd.f32 %v1139_v39, %v1138_v38 }
 0x263   :  { %v682_v42 = vadd.f32 %v1140_v41, %v1082_v35  ;;  %v685_v43 = vmax.f32 %v679_v40, 0.0 }
 0x265   :  { %v686_v44 = vmax.f32 %v682_v42, 0.0 }
 0x267   :  { %v687_v46 = vpack.c.bf16 %v686_v44, %v685_v43 }
 0x269   :  { %1176 = vmatmul.mubr.bf16.vlgmr.msra.gmra.mrb[4].mxu1 %v687_v46 }
 0x26a   :  { %1180 = vmatpush3.bf16.msra.mxu1 %v1323_v45  ;;  %1187 = vmatprep.mubr.msk.bf16.mxu1 %vm1456_vm0, %v1455_v4 }
 0x26b   :  { %1181 = vmatprep.subr.bf16.mxu1 %v1455_v4 }
 0x26e   :  { %1182 = vmatpush3.bf16.msra.mxu1 %v1324_v47 }
 0x26f   :  { %1183 = vmatprep.subr.bf16.mxu1 %v1455_v4 }
 0x272   :  { %1184 = vmatpush3.bf16.msra.mxu1 %v1325_v48 }
 0x273   :  { %1185 = vmatprep.subr.bf16.mxu1 %v1455_v4 }
 0x276   :  { %1186 = vmatpush3.bf16.msra.mxu1 %v1326_v49 }
 0x277   :  { %1191 = vmatprep.subr.bf16.mxu1 %v1455_v4 }
 0x33c   :  { %v793_v51 = vpop.f32.mrb[4].mxu1 }
 0x33d   :  { %v794_v52 = vadd.f32 %v1099_v50, %v793_v51  ;;  %v1177_v53 = vpop.f32.mrb[5].mxu1 }
 0x33e   :  { %v796_v54 = vpop.f32.mrb[6].mxu1 }
 0x33f   :  { %v797_v55 = vadd.f32 %v1099_v50, %v796_v54  ;;  %v1178_v56 = vpop.f32.mrb[7].mxu1  ;;  %v800_v57 = vmax.f32 %v794_v52, 0.0 }
 0x341   :  { %v801_v58 = vmax.f32 %v797_v55, 0.0 }
 0x343   :  { %v802_v59 = vpack.c.bf16 %v801_v58, %v800_v57 }
 0x345   :  { %1188 = vmatmul.mubr.msk.bf16.vlgmr.msra.gmra.mrb[8].mxu1 %vm842_vm1, %v802_v59 }
 0x346   :  { %1193 = vmatprep.mubr.msk.bf16.mxu1 %vm1456_vm0, %v1455_v4  ;;  %1192 = vmatpush3.bf16.msra.mxu1 %v1327_v60 }
 0x347   :  { %1197 = vmatprep.subr.bf16.mxu1 %v1455_v4 }
 0x418   :  { %v880_v62 = vpop.f32.mrb[8].mxu1 }
 0x419   :  { %v881_v63 = vadd.f32 %v1108_v61, %v880_v62  ;;  %v1189_v0 = vpop.f32.mrb[9].mxu1 }
 0x41a   :  { %v883_v1 = vpop.f32.mrb[10].mxu1 }
 0x41b   :  { %v884_v2 = vadd.f32 %v1108_v61, %v883_v1  ;;  %v1190_v3 = vpop.f32.mrb[11].mxu1  ;;  %v887_v5 = vmax.f32 %v881_v63, 0.0 }
 0x41d   :  { %v888_v6 = vmax.f32 %v884_v2, 0.0 }
 0x41f   :  { %v889_v7 = vpack.c.bf16 %v888_v6, %v887_v5 }
 0x421   :  { %1194 = vmatmul.mubr.msk.bf16.vlgmr.msra.gmra.mrb[12].mxu1 %vm905_vm2, %v889_v7 }
 0x422   :  { %1199 = vmatprep.mubr.msk.bf16.mxu1 %vm1456_vm0, %v1455_v4  ;;  %1198 = vmatpush3.bf16.msra.mxu1 %v967_v9 }
 0x4f4   :  { %v943_v11 = vpop.f32.mrb[12].mxu1 }
 0x4f5   :  { %v944_v12 = vadd.f32 %v1114_v10, %v943_v11  ;;  %v1195_v13 = vpop.f32.mrb[13].mxu1 }
 0x4f6   :  { %v946_v14 = vpop.f32.mrb[14].mxu1 }
 0x4f7   :  { %v947_v15 = vadd.f32 %v1114_v10, %v946_v14  ;;  %v1196_v16 = vpop.f32.mrb[15].mxu1  ;;  %v950_v17 = vmax.f32 %v944_v12, 0.0 }
 0x4f9   :  { %v951_v18 = vmax.f32 %v947_v15, 0.0 }
 0x4fb   :  { %v952_v4 = vpack.c.bf16 %v951_v18, %v950_v17 }
 0x4fd   :  { %1200 = vmatmul.mubr.msk.bf16.vlgmr.msra.gmra.mrb[16].mxu1 %vm961_vm4, %v952_v4 }
 0x5d0   :  { %v1003_v20 = vpop.f32.mrb[16].mxu1 }
 0x5d1   :  { %v1004_v21 = vadd.f32 %v1117_v19, %v1003_v20  ;;  %v1201_v22 = vpop.f32.mrb[17].mxu1 }
 0x5d2   :  { %v1006_v23 = vpop.f32.mrb[18].mxu1 }
 0x5d3   :  { %1010 = vst.msk [vmem:[#allocation10] sm:$0xff] %vm905_vm2, %v1004_v21  ;;  %v1007_v24 = vadd.f32 %v1117_v19, %v1006_v23  ;;  %v1202_v25 = vpop.f32.mrb[19].mxu1 }
 0x5d5   :  { %1011 = vst.msk [vmem:[#allocation10 + $0x8] sm:$0xff] %vm905_vm2, %v1007_v24 }
 0x5d6   :  { %1427 = shalt.err (!%p1424_p8)
}
 0x5d7   :  { %s1428_s23 = scalar_lea.hbm %s1734_s13, 256 }
 0x5d8   :  { %p1429_p9 = scmp.ne.s32.totalorder %s1734_s13, %s1428_s23  ;;  %p1432_p10 = scmp.lt.u32.totalorder %s1428_s23, %s1734_s13 }
 0x5da   :  { %p1434_p11 = pnand %p1432_p10, %p1429_p9 }
 0x5dc   :  { %1437 = shalt.err (!%p1434_p11)
}
 0x5dd   :  { %1023 = dma.vmem_to_hbm [thread:$0]  %s1018_s15, 256, %s1734_s13, [#allocation4], %s1447_s18, %s1447_s18, %s1448_s19  }
 0x5de   :  { %1444 = dma.done.wait [#allocation4], 256  }
 0x5df   :  { %1445 = vsyncadd [#allocation4], 4294967040 }
 0x5e0   :  { %1027 = vsyncpa [#allocation3], 1 }
 0x5e1   :  { %1028 = vsyncpa [#allocation6], 1 }
 0x5e2   :  { %1029 = vsyncpa [#allocation9], 1 }
 0x5e3   :  { %1030 = vsyncpa [#allocation4], 1 }

</bundles_post_ra>
